<compile_context>
chip_gen: v7x
topology: tpu7x:2x2x1
jax: 0.10.0
libtpu: 0.0.40
codegen_flags: <defaults>
</compile_context>

<pallas_src>
import jax
import jax.numpy as jnp
from jax.experimental import pallas as pl
from jax.experimental.pallas import tpu as pltpu

_LANE = 128  # TPU vreg lane width; also the per-head lane padding


def actor_net_kernel(x_ref, w1_ref, b1_ref, w2_ref, b2_ref, wh_ref, bh_ref,
                     mu_ref, std_ref):
    # fc1: K = padded state_dims (tiny). bf16 operands, f32 accumulate.
    h1 = jnp.dot(x_ref[...].astype(jnp.bfloat16), w1_ref[...],
                 preferred_element_type=jnp.float32)
    h1 = jnp.maximum(h1 + b1_ref[...], 0.0)

    # fc2: 256x256, the dominant matmul. bf16 operands, f32 accumulate.
    h2 = jnp.dot(h1.astype(jnp.bfloat16), w2_ref[...],
                 preferred_element_type=jnp.float32)
    h2 = jnp.maximum(h2 + b2_ref[...], 0.0)

    # Fused mu/log_sigma head, lane-padded to 2*128 output columns.
    head = jnp.dot(h2.astype(jnp.bfloat16), wh_ref[...],
                   preferred_element_type=jnp.float32) + bh_ref[...]

    mu_ref[...] = head[:, :_LANE]                        # lane-dense slab
    log_std = jnp.clip(head[:, _LANE:], -20.0, 2.0)
    std_ref[...] = jnp.exp(log_std)                      # lane-dense slab


def actor_net_forward(state, params, *, block_b=128):
    """state: (B, state_dims) f32. Returns (mean, std), each (B, action_dims) f32."""
    w1, b1, w2, b2, w_mu, b_mu, w_ls, b_ls = params
    B, S = state.shape
    F1 = w1.shape[1]
    F2 = w2.shape[1]
    A = w_mu.shape[1]
    assert A <= _LANE, "action_dims must fit within one 128-lane head"

    # Pad fc1 contraction dim to a sublane multiple; pad batch to a tile multiple.
    S_pad = max(8, pl.cdiv(S, 8) * 8)
    B_pad = pl.cdiv(B, block_b) * block_b

    x = jnp.zeros((B_pad, S_pad), jnp.float32).at[:B, :S].set(state)
    w1p = jnp.zeros((S_pad, F1), jnp.float32).at[:S, :].set(w1).astype(jnp.bfloat16)
    w2b = w2.astype(jnp.bfloat16)

    # Fused lane-padded head: cols [0:A) -> mu, cols [128:128+A) -> log_sigma.
    w_head = jnp.zeros((F2, 2 * _LANE), jnp.float32)
    w_head = w_head.at[:, :A].set(w_mu).at[:, _LANE:_LANE + A].set(w_ls)
    w_head = w_head.astype(jnp.bfloat16)
    b_head = jnp.zeros((1, 2 * _LANE), jnp.float32)
    b_head = b_head.at[:, :A].set(b_mu).at[:, _LANE:_LANE + A].set(b_ls)

    grid = (B_pad // block_b,)

    flops = 2 * B_pad * (S_pad * F1 + F1 * F2 + F2 * 2 * _LANE)
    bytes_accessed = (x.size * 4 + w1p.size * 2 + w2b.size * 2 + w_head.size * 2
                      + (F1 + F2 + 2 * _LANE) * 4 + 2 * B_pad * _LANE * 4)

    mu_pad, std_pad = pl.pallas_call(
        actor_net_kernel,
        out_shape=(
            jax.ShapeDtypeStruct((B_pad, _LANE), jnp.float32),
            jax.ShapeDtypeStruct((B_pad, _LANE), jnp.float32),
        ),
        grid_spec=pltpu.PrefetchScalarGridSpec(
            num_scalar_prefetch=0,
            grid=grid,
            in_specs=[
                pl.BlockSpec((block_b, S_pad), lambda i: (i, 0)),     # state tile
                pl.BlockSpec((S_pad, F1), lambda i: (0, 0)),          # W1 (resident, bf16)
                pl.BlockSpec((1, F1), lambda i: (0, 0)),              # b1 (f32 row)
                pl.BlockSpec((F1, F2), lambda i: (0, 0)),             # W2 (resident, bf16)
                pl.BlockSpec((1, F2), lambda i: (0, 0)),              # b2 (f32 row)
                pl.BlockSpec((F2, 2 * _LANE), lambda i: (0, 0)),      # fused head W (bf16)
                pl.BlockSpec((1, 2 * _LANE), lambda i: (0, 0)),       # fused head bias
            ],
            out_specs=(
                pl.BlockSpec((block_b, _LANE), lambda i: (i, 0)),     # mean slab
                pl.BlockSpec((block_b, _LANE), lambda i: (i, 0)),     # std slab
            ),
        ),
        compiler_params=pltpu.CompilerParams(
            dimension_semantics=("parallel",),
        ),
        cost_estimate=pl.CostEstimate(
            flops=flops,
            transcendentals=B_pad * _LANE,
            bytes_accessed=bytes_accessed,
        ),
    )(x, w1p, b1, w2b, b2, w_head, b_head)

    return mu_pad[:B, :A], std_pad[:B, :A]


def init_params(key, state_dims, action_dims, fc1_dims=256, fc2_dims=256):
    """Deterministic init mimicking nn.Linear uniform(-1/sqrt(fan_in), 1/sqrt(fan_in)).

    Weights are stored (in_features, out_features), i.e. transposed vs. PyTorch,
    so y = x @ W + b matches torch's x @ W.T + b.
    """
    ks = jax.random.split(key, 8)

    def uni(k, shape, fan_in):
        bound = 1.0 / jnp.sqrt(jnp.float32(fan_in))
        return jax.random.uniform(k, shape, jnp.float32, -bound, bound)

    w1 = uni(ks[0], (state_dims, fc1_dims), state_dims)
    b1 = uni(ks[1], (1, fc1_dims), state_dims)
    w2 = uni(ks[2], (fc1_dims, fc2_dims), fc1_dims)
    b2 = uni(ks[3], (1, fc2_dims), fc1_dims)
    w_mu = uni(ks[4], (fc2_dims, action_dims), fc2_dims)
    b_mu = uni(ks[5], (1, action_dims), fc2_dims)
    w_ls = uni(ks[6], (fc2_dims, action_dims), fc2_dims)
    b_ls = uni(ks[7], (1, action_dims), fc2_dims)
    return (w1, b1, w2, b2, w_mu, b_mu, w_ls, b_ls)


def actor_net_ref(state, params, *, match_kernel_precision=False):
    """Pure-JAX reference. If match_kernel_precision, mimics bf16-in/f32-acc matmuls."""
    w1, b1, w2, b2, w_mu, b_mu, w_ls, b_ls = params
    if match_kernel_precision:
        bf = jnp.bfloat16
        h1 = jnp.dot(state.astype(bf), w1.astype(bf),
                     preferred_element_type=jnp.float32) + b1
        h1 = jnp.maximum(h1, 0.0)
        h2 = jnp.dot(h1.astype(bf), w2.astype(bf),
                     preferred_element_type=jnp.float32) + b2
        h2 = jnp.maximum(h2, 0.0)
        mean = jnp.dot(h2.astype(bf), w_mu.astype(bf),
                       preferred_element_type=jnp.float32) + b_mu
        log_std = jnp.dot(h2.astype(bf), w_ls.astype(bf),
                          preferred_element_type=jnp.float32) + b_ls
    else:
        h1 = jnp.maximum(state @ w1 + b1, 0.0)
        h2 = jnp.maximum(h1 @ w2 + b2, 0.0)
        mean = h2 @ w_mu + b_mu
        log_std = h2 @ w_ls + b_ls
    log_std = jnp.clip(log_std, -20.0, 2.0)
    return mean, jnp.exp(log_std)


if __name__ == "__main__":
    key = jax.random.PRNGKey(0)
    kp, kx = jax.random.split(key)

    B = 8             # small batch
    state_dims = 3    # pendulum observation dim
    action_dims = 1   # pendulum action dim
    params = init_params(kp, state_dims, action_dims, fc1_dims=256, fc2_dims=256)
    state = jax.random.normal(kx, (B, state_dims), jnp.float32)

    mean, std = actor_net_forward(state, params)
    mean, std = jax.block_until_ready((mean, std))

    assert mean.shape == (B, action_dims) and std.shape == (B, action_dims)
    assert bool(jnp.all(std > 0.0)), "std must be positive"

    # Precision-matched reference (same bf16-in / f32-acc matmuls).
    mean_m, std_m = actor_net_ref(state, params, match_kernel_precision=True)
    assert jnp.allclose(mean, mean_m, atol=1e-3, rtol=1e-3), "mean mismatch vs matched ref"
    assert jnp.allclose(std, std_m, atol=1e-3, rtol=1e-3), "std mismatch vs matched ref"

    # Loose sanity check against full-f32 reference.
    mean_f, std_f = actor_net_ref(state, params)
    assert jnp.allclose(mean, mean_f, atol=5e-2), "mean far from f32 ref"
    assert jnp.allclose(std, std_f, atol=5e-2), "std far from f32 ref"

    print("KERNEL_OK")
</pallas_src>

<mosaic_0001>
module attributes {stable_mosaic.version = 11 : i64} {
  func.func @actor_net_kernel(%arg0: i32, %arg1: memref<128x8xf32, #tpu.memory_space<vmem>>, %arg2: memref<8x256xbf16, #tpu.memory_space<vmem>>, %arg3: memref<1x256xf32, #tpu.memory_space<vmem>>, %arg4: memref<256x256xbf16, #tpu.memory_space<vmem>>, %arg5: memref<1x256xf32, #tpu.memory_space<vmem>>, %arg6: memref<256x256xbf16, #tpu.memory_space<vmem>>, %arg7: memref<1x256xf32, #tpu.memory_space<vmem>>, %arg8: memref<128x128xf32, #tpu.memory_space<vmem>>, %arg9: memref<128x128xf32, #tpu.memory_space<vmem>>) attributes {dimension_semantics = [#tpu.dimension_semantics<parallel>], iteration_bounds = array<i64: 1>, scalar_prefetch = 0 : i64, scratch_operands = 0 : i64, tpu.core_type = #tpu.core_type<tc>, window_params = [{transform_indices = @transform_0, window_bounds = array<i64: 128, 8>}, {pipeline_mode = #tpu.pipeline_mode<synchronous>, transform_indices = @transform_1, window_bounds = array<i64: 8, 256>}, {pipeline_mode = #tpu.pipeline_mode<synchronous>, transform_indices = @transform_2, window_bounds = array<i64: 1, 256>}, {pipeline_mode = #tpu.pipeline_mode<synchronous>, transform_indices = @transform_3, window_bounds = array<i64: 256, 256>}, {pipeline_mode = #tpu.pipeline_mode<synchronous>, transform_indices = @transform_4, window_bounds = array<i64: 1, 256>}, {pipeline_mode = #tpu.pipeline_mode<synchronous>, transform_indices = @transform_5, window_bounds = array<i64: 256, 256>}, {pipeline_mode = #tpu.pipeline_mode<synchronous>, transform_indices = @transform_6, window_bounds = array<i64: 1, 256>}, {transform_indices = @transform_7, window_bounds = array<i64: 128, 128>}, {transform_indices = @transform_8, window_bounds = array<i64: 128, 128>}]} {
    %c0 = arith.constant 0 : index
    %c0_0 = arith.constant 0 : index
    %0 = vector.load %arg1[%c0, %c0_0] : memref<128x8xf32, #tpu.memory_space<vmem>>, vector<128x8xf32>
    %1 = arith.truncf %0 : vector<128x8xf32> to vector<128x8xbf16>
    %c0_1 = arith.constant 0 : index
    %c0_2 = arith.constant 0 : index
    %2 = vector.load %arg2[%c0_1, %c0_2] : memref<8x256xbf16, #tpu.memory_space<vmem>>, vector<8x256xbf16>
    %cst = arith.constant dense<0.000000e+00> : vector<128x256xf32>
    %3 = tpu.matmul %1, %2, %cst {dimension_numbers = #tpu.dot_dimension_numbers<[1], [0], [0], [1], [0, 0, 1, 1], [], []>} : vector<128x8xbf16>, vector<8x256xbf16>, vector<128x256xf32> -> vector<128x256xf32>
    %c0_3 = arith.constant 0 : index
    %c0_4 = arith.constant 0 : index
    %4 = vector.load %arg3[%c0_3, %c0_4] : memref<1x256xf32, #tpu.memory_space<vmem>>, vector<1x256xf32>
    %5 = vector.broadcast %4 : vector<1x256xf32> to vector<128x256xf32>
    %6 = arith.addf %3, %5 : vector<128x256xf32>
    %cst_5 = arith.constant 0.000000e+00 : f32
    %7 = vector.broadcast %cst_5 : f32 to vector<128x256xf32>
    %8 = arith.maximumf %6, %7 : vector<128x256xf32>
    %9 = arith.truncf %8 : vector<128x256xf32> to vector<128x256xbf16>
    %c0_6 = arith.constant 0 : index
    %c0_7 = arith.constant 0 : index
    %10 = vector.load %arg4[%c0_6, %c0_7] : memref<256x256xbf16, #tpu.memory_space<vmem>>, vector<256x256xbf16>
    %cst_8 = arith.constant dense<0.000000e+00> : vector<128x256xf32>
    %11 = tpu.matmul %9, %10, %cst_8 {dimension_numbers = #tpu.dot_dimension_numbers<[1], [0], [0], [1], [0, 0, 1, 1], [], []>} : vector<128x256xbf16>, vector<256x256xbf16>, vector<128x256xf32> -> vector<128x256xf32>
    %c0_9 = arith.constant 0 : index
    %c0_10 = arith.constant 0 : index
    %12 = vector.load %arg5[%c0_9, %c0_10] : memref<1x256xf32, #tpu.memory_space<vmem>>, vector<1x256xf32>
    %13 = vector.broadcast %12 : vector<1x256xf32> to vector<128x256xf32>
    %14 = arith.addf %11, %13 : vector<128x256xf32>
    %cst_11 = arith.constant 0.000000e+00 : f32
    %15 = vector.broadcast %cst_11 : f32 to vector<128x256xf32>
    %16 = arith.maximumf %14, %15 : vector<128x256xf32>
    %17 = arith.truncf %16 : vector<128x256xf32> to vector<128x256xbf16>
    %c0_12 = arith.constant 0 : index
    %c0_13 = arith.constant 0 : index
    %18 = vector.load %arg6[%c0_12, %c0_13] : memref<256x256xbf16, #tpu.memory_space<vmem>>, vector<256x256xbf16>
    %cst_14 = arith.constant dense<0.000000e+00> : vector<128x256xf32>
    %19 = tpu.matmul %17, %18, %cst_14 {dimension_numbers = #tpu.dot_dimension_numbers<[1], [0], [0], [1], [0, 0, 1, 1], [], []>} : vector<128x256xbf16>, vector<256x256xbf16>, vector<128x256xf32> -> vector<128x256xf32>
    %c0_15 = arith.constant 0 : index
    %c0_16 = arith.constant 0 : index
    %20 = vector.load %arg7[%c0_15, %c0_16] : memref<1x256xf32, #tpu.memory_space<vmem>>, vector<1x256xf32>
    %21 = vector.broadcast %20 : vector<1x256xf32> to vector<128x256xf32>
    %22 = arith.addf %19, %21 : vector<128x256xf32>
    %23 = vector.extract_strided_slice %22 {offsets = [0, 0], sizes = [128, 128], strides = [1, 1]} : vector<128x256xf32> to vector<128x128xf32>
    %c0_17 = arith.constant 0 : index
    %c0_18 = arith.constant 0 : index
    %24 = vector.load %arg8[%c0_17, %c0_18] : memref<128x128xf32, #tpu.memory_space<vmem>>, vector<128x128xf32>
    tpu.vector_store %arg8[%c0_17, %c0_18], %23 {strides = array<i32>} : memref<128x128xf32, #tpu.memory_space<vmem>>, vector<128x128xf32>,
    %25 = vector.extract_strided_slice %22 {offsets = [0, 128], sizes = [128, 128], strides = [1, 1]} : vector<128x256xf32> to vector<128x128xf32>
    %cst_19 = arith.constant -2.000000e+01 : f32
    %cst_20 = arith.constant 2.000000e+00 : f32
    %26 = vector.broadcast %cst_19 : f32 to vector<128x128xf32>
    %27 = arith.maximumf %26, %25 : vector<128x128xf32>
    %28 = vector.broadcast %cst_20 : f32 to vector<128x128xf32>
    %29 = arith.minimumf %28, %27 : vector<128x128xf32>
    %30 = math.exp %29 : vector<128x128xf32>
    %c0_21 = arith.constant 0 : index
    %c0_22 = arith.constant 0 : index
    %31 = vector.load %arg9[%c0_21, %c0_22] : memref<128x128xf32, #tpu.memory_space<vmem>>, vector<128x128xf32>
    tpu.vector_store %arg9[%c0_21, %c0_22], %30 {strides = array<i32>} : memref<128x128xf32, #tpu.memory_space<vmem>>, vector<128x128xf32>,
    return
  }
  func.func @transform_0(%arg0: i32) -> (i32, i32) {
    %c0_i32 = arith.constant 0 : i32
    %c0_i32_0 = arith.constant 0 : i32
    return %arg0, %c0_i32 : i32, i32
  }
  func.func @transform_1(%arg0: i32) -> (i32, i32) {
    %c0_i32 = arith.constant 0 : i32
    %c0_i32_0 = arith.constant 0 : i32
    %c0_i32_1 = arith.constant 0 : i32
    return %c0_i32, %c0_i32_0 : i32, i32
  }
  func.func @transform_2(%arg0: i32) -> (i32, i32) {
    %c0_i32 = arith.constant 0 : i32
    %c0_i32_0 = arith.constant 0 : i32
    %c0_i32_1 = arith.constant 0 : i32
    return %c0_i32, %c0_i32_0 : i32, i32
  }
  func.func @transform_3(%arg0: i32) -> (i32, i32) {
    %c0_i32 = arith.constant 0 : i32
    %c0_i32_0 = arith.constant 0 : i32
    %c0_i32_1 = arith.constant 0 : i32
    return %c0_i32, %c0_i32_0 : i32, i32
  }
  func.func @transform_4(%arg0: i32) -> (i32, i32) {
    %c0_i32 = arith.constant 0 : i32
    %c0_i32_0 = arith.constant 0 : i32
    %c0_i32_1 = arith.constant 0 : i32
    return %c0_i32, %c0_i32_0 : i32, i32
  }
  func.func @transform_5(%arg0: i32) -> (i32, i32) {
    %c0_i32 = arith.constant 0 : i32
    %c0_i32_0 = arith.constant 0 : i32
    %c0_i32_1 = arith.constant 0 : i32
    return %c0_i32, %c0_i32_0 : i32, i32
  }
  func.func @transform_6(%arg0: i32) -> (i32, i32) {
    %c0_i32 = arith.constant 0 : i32
    %c0_i32_0 = arith.constant 0 : i32
    %c0_i32_1 = arith.constant 0 : i32
    return %c0_i32, %c0_i32_0 : i32, i32
  }
  func.func @transform_7(%arg0: i32) -> (i32, i32) {
    %c0_i32 = arith.constant 0 : i32
    %c0_i32_0 = arith.constant 0 : i32
    return %arg0, %c0_i32 : i32, i32
  }
  func.func @transform_8(%arg0: i32) -> (i32, i32) {
    %c0_i32 = arith.constant 0 : i32
    %c0_i32_0 = arith.constant 0 : i32
    return %arg0, %c0_i32 : i32, i32
  }
}

</mosaic_0001>

<bundles_post_ra>
// kernel: tpu_custom_call.1
= control target key start
LH: loop header
LB: loop body
LE: loop exit
PB: predicated region body
PF: predicated region fallthrough
CT: control target
= control target key end

     0   :  { %14 = vsyncpa [#allocation3], 0  ;;  %s1720_s0 = inlined_call_operand.vmem [shape: f32[128,8], index: 0, kind: input, shape index: {}]   ;;  %s1721_s1 = inlined_call_operand.vmem [shape: bf16[8,256], index: 1, kind: input, shape index: {}]   ;;  %s1722_s2 = inlined_call_operand.vmem [shape: f32[1,256], index: 2, kind: input, shape index: {}]   ;;  %s1723_s3 = inlined_call_operand.hbm [shape: bf16[256,256], index: 3, kind: input, shape index: {}]   ;;  %s1724_s4 = inlined_call_operand.vmem [shape: f32[1,256], index: 4, kind: input, shape index: {}]   ;;  %s1725_s5 = inlined_call_operand.hbm [shape: bf16[256,256], index: 5, kind: input, shape index: {}]   ;;  %s1726_s6 = inlined_call_operand.vmem [shape: f32[1,256], index: 6, kind: input, shape index: {}]   ;;  %s1727_s7 = inlined_call_operand.hbm [shape: f32[128,128], index: 7, kind: output, shape index: {0}]   ;;  %s1728_s8 = inlined_call_operand.hbm [shape: f32[128,128], index: 8, kind: output, shape index: {1}]  }
   0x1   :  { %15 = vsyncpa [#allocation6], 0 }
   0x2   :  { %16 = vsyncpa [#allocation4], 0 }
   0x3   :  { %17 = vsyncpa [#allocation9], 0  ;;  %s1414_s27 = smov [#allocation2]   ;;  %s1318_s9 = scalar_lea.hbm %s1723_s3, 4096 }
   0x4   :  { %s29_s28 = sshll.u32 %s1414_s27, 4  ;;  %p1319_p0 = scmp.ne.s32.totalorder %s1723_s3, %s1318_s9  ;;  %s30_s28 = int_to_ptr.vmem [resolvable:$true] %s29_s28 }
   0x5   :  { %p1322_p1 = scmp.lt.u32.totalorder %s1318_s9, %s1723_s3 }
   0x7   :  { %p1324_p2 = pnand %p1322_p1, %p1319_p0 }
   0x9   :  { %1327 = shalt.err (!%p1324_p2)
}
   0xa   :  { %s1328_s14 = scalar_lea.vmem %s30_s28, 4096  ;;  %p1333_p4 = scmp.lt.s32.totalorder %s30_s28, %s30_s28 }
   0xb   :  { %p1329_p3 = scmp.ne.s32.totalorder %s30_s28, %s1328_s14  ;;  %p1334_p5 = scmp.lt.s32.totalorder %s1328_s14, %s1328_s14 }
   0xd   :  { %p1335_p6 = por %p1334_p5, %p1333_p4 }
   0xf   :  { %p1336_p7 = pnand %p1335_p6, %p1329_p3 }
  0x11   :  { %1339 = shalt.err (!%p1336_p7)
}
  0x12   :  { %s1415_s15 = smov 128   ;;  %s1416_s16 = smov 8  }
  0x13   :  { %35 = dma.hbm_to_vmem [thread:$0]  %s1723_s3, 4096, %s30_s28, [#allocation3], %s1415_s15, %s1415_s15, %s1416_s16  }
  0x14   :  { %s1417_s19 = smov [#allocation5]   ;;  %s1340_s23 = scalar_lea.hbm %s1725_s5, 4096 }
  0x15   :  { %s43_s20 = sshll.u32 %s1417_s19, 4  ;;  %p1341_p8 = scmp.ne.s32.totalorder %s1725_s5, %s1340_s23  ;;  %s44_s20 = int_to_ptr.vmem [resolvable:$true] %s43_s20 }
  0x16   :  { %p1344_p9 = scmp.lt.u32.totalorder %s1340_s23, %s1725_s5 }
  0x18   :  { %p1346_p10 = pnand %p1344_p9, %p1341_p8 }
  0x1a   :  { %1349 = shalt.err (!%p1346_p10)
}
  0x1b   :  { %s1350_s29 = scalar_lea.vmem %s44_s20, 4096  ;;  %p1355_p12 = scmp.lt.s32.totalorder %s44_s20, %s44_s20 }
  0x1c   :  { %p1351_p11 = scmp.ne.s32.totalorder %s44_s20, %s1350_s29  ;;  %p1356_p13 = scmp.lt.s32.totalorder %s1350_s29, %s1350_s29 }
  0x1e   :  { %p1357_p0 = por %p1356_p13, %p1355_p12 }
  0x20   :  { %p1358_p1 = pnand %p1357_p0, %p1351_p11 }
  0x22   :  { %1361 = shalt.err (!%p1358_p1)
}
  0x23   :  { %49 = dma.hbm_to_vmem [thread:$0]  %s1725_s5, 4096, %s44_s20, [#allocation6], %s1415_s15, %s1415_s15, %s1416_s16  }
  0x24   :  { %1406 = dma.done.wait [#allocation3], 4096  }
  0x25   :  { %1407 = vsyncadd [#allocation3], 4294963200 }
  0x26   :  { %1408 = dma.done.wait [#allocation6], 4096  }
  0x27   :  { %1409 = vsyncadd [#allocation6], 4294963200  ;;  %v1418_v0 = vmov 0   ;;  %v83_v1 = vld [vmem:[%s1721_s1] sm:$0xff]  ;;  %vm126_vm0 = vcmask 1043456   ;;  %v60_v3 = vld [vmem:[%s1720_s0 + $0x8] sm:$0xff] }
  0x28   :  { %165 = vmatprep.mubr.bf16.mxu0 %v1418_v0  ;;  %v59_v2 = vld [vmem:[%s1720_s0] sm:$0xff]  ;;  %v1107_v4 = vcombine.high %v83_v1, %v83_v1  ;;  %v1106_v5 = vcombine.low %v83_v1, %v83_v1  ;;  %vm101_vm1 = vcmask 64512   ;;  %v61_v8 = vld [vmem:[%s1720_s0 + $0x10] sm:$0xff]  ;;  %v62_v12 = vld [vmem:[%s1720_s0 + $0x18] sm:$0xff] }
  0x29   :  { %v75_v7 = vpack.c.bf16 %v60_v3, %v59_v2  ;;  %v1190_v9 = vld [vmem:[#allocation2 + $0x4] ss:$8 sps:$4 sm:$0xff]   ;;  %v1192_v10 = vld [vmem:[#allocation2] ss:$8 sps:$4 sm:$0xff]   ;;  %v1193_v11 = vld [vmem:[#allocation2 + $0x14] ss:$8 sps:$4 sm:$0xff]   ;;  %v76_v15 = vpack.c.bf16 %v62_v12, %v61_v8 }
  0x2a   :  { %1108 = vmatprep.subr.msk.bf16.mxu0 %vm126_vm0, %v1107_v4  ;;  %v128_v6 = vsel %vm126_vm0, %v1106_v5, 0  ;;  %498 = vmatprep.subr.bf16.mxu1 %v1190_v9  ;;  %v1195_v13 = vld [vmem:[#allocation2 + $0x10] ss:$8 sps:$4 sm:$0xff]   ;;  %v1196_v14 = vld [vmem:[#allocation2 + $0x24] ss:$8 sps:$4 sm:$0xff]  }
  0x2b   :  { %134 = vmatpush1.bf16.msra.mxu0 %v128_v6  ;;  %499 = vmatpush1.bf16.msra.mxu1 %v1192_v10  ;;  %v1198_v16 = vld [vmem:[#allocation2 + $0x20] ss:$8 sps:$4 sm:$0xff]   ;;  %v1199_v17 = vld [vmem:[#allocation2 + $0x34] ss:$8 sps:$4 sm:$0xff]   ;;  %v1201_v20 = vld [vmem:[#allocation2 + $0x30] ss:$8 sps:$4 sm:$0xff]  }
  0x2c   :  { %500 = vmatprep.subr.bf16.mxu1 %v1193_v11  ;;  %v63_v18 = vld [vmem:[%s1720_s0 + $0x20] sm:$0xff]  ;;  %v64_v19 = vld [vmem:[%s1720_s0 + $0x28] sm:$0xff]  ;;  %v65_v24 = vld [vmem:[%s1720_s0 + $0x30] sm:$0xff] }
  0x2d   :  { %v1202_v21 = vld [vmem:[#allocation2 + $0x44] ss:$8 sps:$4 sm:$0xff]   ;;  %v77_v22 = vpack.c.bf16 %v64_v19, %v63_v18  ;;  %v1204_v23 = vld [vmem:[#allocation2 + $0x40] ss:$8 sps:$4 sm:$0xff]   ;;  %v66_v25 = vld [vmem:[%s1720_s0 + $0x38] sm:$0xff] }
  0x2e   :  { %1109 = vmatmul.mubr.msk.bf16.vlgmr.msra.gmra.mrb[0].mxu0 %vm101_vm1, %v75_v7  ;;  %v1205_v26 = vld [vmem:[#allocation2 + $0x54] ss:$8 sps:$4 sm:$0xff]   ;;  %v1207_v27 = vld [vmem:[#allocation2 + $0x50] ss:$8 sps:$4 sm:$0xff]   ;;  %v1208_v28 = vld [vmem:[#allocation2 + $0x64] ss:$8 sps:$4 sm:$0xff]   ;;  %v78_v29 = vpack.c.bf16 %v66_v25, %v65_v24 }
  0x2f   :  { %175 = vmatprep.mubr.bf16.mxu0 %v1418_v0  ;;  %501 = vmatpush1.bf16.msra.mxu1 %v1195_v13  ;;  %v1210_v30 = vld [vmem:[#allocation2 + $0x60] ss:$8 sps:$4 sm:$0xff]   ;;  %v1211_v31 = vld [vmem:[#allocation2 + $0x74] ss:$8 sps:$4 sm:$0xff]   ;;  %v1213_v34 = vld [vmem:[#allocation2 + $0x70] ss:$8 sps:$4 sm:$0xff]  }
  0x30   :  { %502 = vmatprep.subr.bf16.mxu1 %v1196_v14  ;;  %v67_v32 = vld [vmem:[%s1720_s0 + $0x40] sm:$0xff]  ;;  %v68_v33 = vld [vmem:[%s1720_s0 + $0x48] sm:$0xff]  ;;  %v1217_v38 = vld [vmem:[#allocation2 + $0x94] ss:$8 sps:$4 sm:$0xff]  }
  0x31   :  { %v1214_v35 = vld [vmem:[#allocation2 + $0x84] ss:$8 sps:$4 sm:$0xff]   ;;  %v79_v36 = vpack.c.bf16 %v68_v33, %v67_v32  ;;  %v1216_v37 = vld [vmem:[#allocation2 + $0x80] ss:$8 sps:$4 sm:$0xff]   ;;  %v69_v39 = vld [vmem:[%s1720_s0 + $0x50] sm:$0xff] }
  0x32   :  { %v70_v40 = vld [vmem:[%s1720_s0 + $0x58] sm:$0xff]  ;;  %v1220_v42 = vld [vmem:[#allocation2 + $0xa4] ss:$8 sps:$4 sm:$0xff]   ;;  %v1222_v44 = vld [vmem:[#allocation2 + $0xa0] ss:$8 sps:$4 sm:$0xff]  }
  0x33   :  { %503 = vmatpush1.bf16.msra.mxu1 %v1198_v16  ;;  %v1219_v41 = vld [vmem:[#allocation2 + $0x90] ss:$8 sps:$4 sm:$0xff]   ;;  %v80_v43 = vpack.c.bf16 %v70_v40, %v69_v39  ;;  %v1223_v45 = vld [vmem:[#allocation2 + $0xb4] ss:$8 sps:$4 sm:$0xff]   ;;  %v71_v46 = vld [vmem:[%s1720_s0 + $0x60] sm:$0xff] }
  0x34   :  { %504 = vmatprep.subr.bf16.mxu1 %v1199_v17  ;;  %v72_v47 = vld [vmem:[%s1720_s0 + $0x68] sm:$0xff]  ;;  %v1225_v48 = vld [vmem:[#allocation2 + $0xb0] ss:$8 sps:$4 sm:$0xff]   ;;  %v1229_v52 = vld [vmem:[#allocation2 + $0xd4] ss:$8 sps:$4 sm:$0xff]  }
  0x35   :  { %v1226_v49 = vld [vmem:[#allocation2 + $0xc4] ss:$8 sps:$4 sm:$0xff]   ;;  %v81_v50 = vpack.c.bf16 %v72_v47, %v71_v46  ;;  %v1228_v51 = vld [vmem:[#allocation2 + $0xc0] ss:$8 sps:$4 sm:$0xff]   ;;  %v73_v53 = vld [vmem:[%s1720_s0 + $0x70] sm:$0xff] }
  0x36   :  { %1110 = vmatmul.mubr.msk.bf16.gmra.mrb[4].mxu0 %vm101_vm1, %v76_v15  ;;  %v74_v54 = vld [vmem:[%s1720_s0 + $0x78] sm:$0xff]  ;;  %v1232_v57 = vld [vmem:[#allocation2 + $0xe4] ss:$8 sps:$4 sm:$0xff]   ;;  %v1234_v58 = vld [vmem:[#allocation2 + $0xe0] ss:$8 sps:$4 sm:$0xff]  }
  0x37   :  { %185 = vmatprep.mubr.bf16.mxu0 %v1418_v0  ;;  %505 = vmatpush1.bf16.msra.mxu1 %v1201_v20  ;;  %v82_v55 = vpack.c.bf16 %v74_v54, %v73_v53  ;;  %v1231_v56 = vld [vmem:[#allocation2 + $0xd0] ss:$8 sps:$4 sm:$0xff]   ;;  %v1235_v59 = vld [vmem:[#allocation2 + $0xf4] ss:$8 sps:$4 sm:$0xff]   ;;  %v1238_v61 = vld [vmem:[#allocation5] ss:$8 sps:$4 sm:$0xff]  }
  0x38   :  { %506 = vmatprep.subr.bf16.mxu1 %v1202_v21  ;;  %v1237_v60 = vld [vmem:[#allocation2 + $0xf0] ss:$8 sps:$4 sm:$0xff]   ;;  %v1240_v62 = vld [vmem:[#allocation5 + $0x4] ss:$8 sps:$4 sm:$0xff]   ;;  %v1243_v63 = vld [vmem:[#allocation5 + $0x14] ss:$8 sps:$4 sm:$0xff]  }
  0x39   :  { %863 = vmatprep.subr.bf16.mxu0 %v1240_v62  ;;  %v1246_v1 = vld [vmem:[#allocation5 + $0x24] ss:$8 sps:$4 sm:$0xff]   ;;  %v1244_v2 = vld [vmem:[#allocation5 + $0x20] ss:$8 sps:$4 sm:$0xff]   ;;  %v1249_v3 = vld [vmem:[#allocation5 + $0x34] ss:$8 sps:$4 sm:$0xff]  }
  0x3a   :  { %864 = vmatpush1.bf16.msra.mxu0 %v1238_v61  ;;  %v1247_v4 = vld [vmem:[#allocation5 + $0x30] ss:$8 sps:$4 sm:$0xff]   ;;  %v1252_v5 = vld [vmem:[#allocation5 + $0x44] ss:$8 sps:$4 sm:$0xff]   ;;  %v1250_v6 = vld [vmem:[#allocation5 + $0x40] ss:$8 sps:$4 sm:$0xff]  }
  0x3b   :  { %507 = vmatpush1.bf16.msra.mxu1 %v1204_v23  ;;  %865 = vmatprep.subr.bf16.mxu0 %v1243_v63  ;;  %v1255_v7 = vld [vmem:[#allocation5 + $0x54] ss:$8 sps:$4 sm:$0xff]   ;;  %v1253_v8 = vld [vmem:[#allocation5 + $0x50] ss:$8 sps:$4 sm:$0xff]   ;;  %v1258_v9 = vld [vmem:[#allocation5 + $0x64] ss:$8 sps:$4 sm:$0xff]  }
  0x3c   :  { %508 = vmatprep.subr.bf16.mxu1 %v1205_v26  ;;  %v1256_v10 = vld [vmem:[#allocation5 + $0x60] ss:$8 sps:$4 sm:$0xff]   ;;  %v1261_v11 = vld [vmem:[#allocation5 + $0x74] ss:$8 sps:$4 sm:$0xff]   ;;  %v1259_v12 = vld [vmem:[#allocation5 + $0x70] ss:$8 sps:$4 sm:$0xff]  }
  0x3d   :  { %v1264_v13 = vld [vmem:[#allocation5 + $0x84] ss:$8 sps:$4 sm:$0xff]   ;;  %v1262_v14 = vld [vmem:[#allocation5 + $0x80] ss:$8 sps:$4 sm:$0xff]   ;;  %v1267_v15 = vld [vmem:[#allocation5 + $0x94] ss:$8 sps:$4 sm:$0xff]  }
  0x3e   :  { %1111 = vmatmul.mubr.msk.bf16.gmra.mrb[8].mxu0 %vm101_vm1, %v77_v22  ;;  %v1265_v16 = vld [vmem:[#allocation5 + $0x90] ss:$8 sps:$4 sm:$0xff]   ;;  %v1270_v17 = vld [vmem:[#allocation5 + $0xa4] ss:$8 sps:$4 sm:$0xff]   ;;  %v1268_v18 = vld [vmem:[#allocation5 + $0xa0] ss:$8 sps:$4 sm:$0xff]   ;;  %v86_v22 = vlaneseq }
  0x3f   :  { %195 = vmatprep.mubr.bf16.mxu0 %v1418_v0  ;;  %509 = vmatpush1.bf16.msra.mxu1 %v1207_v27  ;;  %v1273_v19 = vld [vmem:[#allocation5 + $0xb4] ss:$8 sps:$4 sm:$0xff]   ;;  %v1271_v20 = vld [vmem:[#allocation5 + $0xb0] ss:$8 sps:$4 sm:$0xff]   ;;  %v1276_v21 = vld [vmem:[#allocation5 + $0xc4] ss:$8 sps:$4 sm:$0xff]  }
  0x40   :  { %510 = vmatprep.subr.bf16.mxu1 %v1208_v28  ;;  %v1274_v23 = vld [vmem:[#allocation5 + $0xc0] ss:$8 sps:$4 sm:$0xff]   ;;  %v1279_v24 = vld [vmem:[#allocation5 + $0xd4] ss:$8 sps:$4 sm:$0xff]   ;;  %v87_v25 = vshrl.u32 %v86_v22, 7 }
  0x41   :  { %v1277_v26 = vld [vmem:[#allocation5 + $0xd0] ss:$8 sps:$4 sm:$0xff]   ;;  %v84_v28 = vld [vmem:[%s1722_s2] sm:$0x3] }
  0x42   :  { %v1563_v27 = vsub.s32 0, %v87_v25 }
  0x43   :  { %511 = vmatpush1.bf16.msra.mxu1 %v1210_v30 }
  0x44   :  { %512 = vmatprep.subr.bf16.mxu1 %v1211_v31  ;;  %v1571_v30 = vrot.slane %v84_v28, %v1563_v27 }
  0x46   :  { %1112 = vmatmul.mubr.msk.bf16.gmra.mrb[12].mxu0 %vm101_vm1, %v78_v29  ;;  %v1568_v29 = vsub.s32 1, %v87_v25 }
  0x47   :  { %205 = vmatprep.mubr.bf16.mxu0 %v1418_v0  ;;  %513 = vmatpush1.bf16.msra.mxu1 %v1213_v34 }
  0x48   :  { %514 = vmatprep.subr.bf16.mxu1 %v1214_v35  ;;  %v1574_v31 = vrot.slane %v84_v28, %v1568_v29 }
  0x4b   :  { %515 = vmatpush1.bf16.msra.mxu1 %v1216_v37 }
  0x4c   :  { %516 = vmatprep.subr.bf16.mxu1 %v1217_v38 }
  0x4e   :  { %1113 = vmatmul.mubr.msk.bf16.gmra.mrb[16].mxu0 %vm101_vm1, %v79_v36 }
  0x4f   :  { %215 = vmatprep.mubr.bf16.mxu0 %v1418_v0  ;;  %517 = vmatpush1.bf16.msra.mxu1 %v1219_v41 }
  0x50   :  { %518 = vmatprep.subr.bf16.mxu1 %v1220_v42 }
  0x53   :  { %519 = vmatpush1.bf16.msra.mxu1 %v1222_v44 }
  0x54   :  { %520 = vmatprep.subr.bf16.mxu1 %v1223_v45 }
  0x56   :  { %1114 = vmatmul.mubr.msk.bf16.gmra.mrb[20].mxu0 %vm101_vm1, %v80_v43 }
  0x57   :  { %225 = vmatprep.mubr.bf16.mxu0 %v1418_v0  ;;  %521 = vmatpush1.bf16.msra.mxu1 %v1225_v48 }
  0x58   :  { %522 = vmatprep.subr.bf16.mxu1 %v1226_v49 }
  0x5b   :  { %523 = vmatpush1.bf16.msra.mxu1 %v1228_v51 }
  0x5c   :  { %524 = vmatprep.subr.bf16.mxu1 %v1229_v52 }
  0x5e   :  { %1115 = vmatmul.mubr.msk.bf16.gmra.mrb[24].mxu0 %vm101_vm1, %v81_v50 }
  0x5f   :  { %235 = vmatprep.mubr.bf16.mxu0 %v1418_v0  ;;  %525 = vmatpush1.bf16.msra.mxu1 %v1231_v56  ;;  %v1241_v0 = vld [vmem:[#allocation5 + $0x10] ss:$8 sps:$4 sm:$0xff]  }
  0x60   :  { %526 = vmatprep.subr.bf16.mxu1 %v1232_v57  ;;  %866 = vmatpush1.bf16.msra.mxu0 %v1241_v0 }
  0x61   :  { %867 = vmatprep.subr.bf16.mxu0 %v1246_v1 }
  0x63   :  { %527 = vmatpush1.bf16.msra.mxu1 %v1234_v58 }
  0x64   :  { %528 = vmatprep.subr.bf16.mxu1 %v1235_v59  ;;  %868 = vmatpush1.bf16.msra.mxu0 %v1244_v2 }
  0x65   :  { %869 = vmatprep.subr.bf16.mxu0 %v1249_v3 }
  0x66   :  { %1116 = vmatmul.mubr.msk.bf16.gmra.mrb[28].mxu0 %vm101_vm1, %v82_v55 }
  0x67   :  { %529 = vmatpush1.bf16.msra.mxu1 %v1237_v60 }
  0x68   :  { %870 = vmatpush1.bf16.msra.mxu0 %v1247_v4 }
  0x69   :  { %871 = vmatprep.subr.bf16.mxu0 %v1252_v5 }
  0x6c   :  { %872 = vmatpush1.bf16.msra.mxu0 %v1250_v6 }
  0x6d   :  { %873 = vmatprep.subr.bf16.mxu0 %v1255_v7 }
  0x70   :  { %874 = vmatpush1.bf16.msra.mxu0 %v1253_v8 }
  0x71   :  { %875 = vmatprep.subr.bf16.mxu0 %v1258_v9 }
  0x74   :  { %876 = vmatpush1.bf16.msra.mxu0 %v1256_v10 }
  0x75   :  { %877 = vmatprep.subr.bf16.mxu0 %v1261_v11 }
  0x78   :  { %878 = vmatpush1.bf16.msra.mxu0 %v1259_v12 }
  0x79   :  { %879 = vmatprep.subr.bf16.mxu0 %v1264_v13 }
  0x7c   :  { %880 = vmatpush1.bf16.msra.mxu0 %v1262_v14 }
  0x7d   :  { %881 = vmatprep.subr.bf16.mxu0 %v1267_v15 }
  0x80   :  { %882 = vmatpush1.bf16.msra.mxu0 %v1265_v16 }
  0x81   :  { %883 = vmatprep.subr.bf16.mxu0 %v1270_v17 }
  0x84   :  { %884 = vmatpush1.bf16.msra.mxu0 %v1268_v18 }
  0x85   :  { %885 = vmatprep.subr.bf16.mxu0 %v1273_v19 }
  0x88   :  { %886 = vmatpush1.bf16.msra.mxu0 %v1271_v20 }
  0x89   :  { %887 = vmatprep.subr.bf16.mxu0 %v1276_v21 }
  0x8c   :  { %888 = vmatpush1.bf16.msra.mxu0 %v1274_v23 }
  0x8d   :  { %889 = vmatprep.subr.bf16.mxu0 %v1279_v24 }
  0x90   :  { %890 = vmatpush1.bf16.msra.mxu0 %v1277_v26 }
 0x101   :  { %v167_v32 = vpop.f32.mrb[0].mxu0 }
 0x102   :  { %v168_v33 = vadd.f32 %v167_v32, %v1571_v30  ;;  %v169_v34 = vpop.f32.mrb[1].mxu0 }
 0x103   :  { %v170_v35 = vadd.f32 %v169_v34, %v1574_v31  ;;  %v171_v36 = vpop.f32.mrb[2].mxu0 }
 0x104   :  { %v172_v37 = vadd.f32 %v171_v36, %v1571_v30  ;;  %v173_v38 = vpop.f32.mrb[3].mxu0  ;;  %v246_v40 = vmax.f32 %v168_v33, 0.0 }
 0x105   :  { %v174_v39 = vadd.f32 %v173_v38, %v1574_v31  ;;  %v247_v42 = vmax.f32 %v170_v35, 0.0 }
 0x106   :  { %v248_v41 = vmax.f32 %v172_v37, 0.0 }
 0x107   :  { %v249_v43 = vmax.f32 %v174_v39, 0.0 }
 0x108   :  { %v278_v44 = vpack.c.bf16 %v248_v41, %v246_v40 }
 0x109   :  { %v177_v45 = vpop.f32.mrb[4].mxu0  ;;  %v279_v46 = vpack.c.bf16 %v249_v43, %v247_v42 }
 0x10a   :  { %v178_v47 = vadd.f32 %v177_v45, %v1571_v30  ;;  %v179_v48 = vpop.f32.mrb[5].mxu0 }
 0x10b   :  { %v180_v49 = vadd.f32 %v179_v48, %v1574_v31  ;;  %v181_v50 = vpop.f32.mrb[6].mxu0  ;;  %530 = vmatprep.mubr.bf16.mxu1 %v279_v46 }
 0x10c   :  { %v182_v51 = vadd.f32 %v181_v50, %v1571_v30  ;;  %v183_v52 = vpop.f32.mrb[7].mxu0  ;;  %531 = vmatmul.mubr.bf16.vlgmr.msra.gmra.mrb[0].mxu1 %v278_v44  ;;  %v250_v54 = vmax.f32 %v178_v47, 0.0 }
 0x10d   :  { %v184_v53 = vadd.f32 %v183_v52, %v1574_v31  ;;  %v251_v56 = vmax.f32 %v180_v49, 0.0 }
 0x10e   :  { %v252_v55 = vmax.f32 %v182_v51, 0.0 }
 0x10f   :  { %v253_v57 = vmax.f32 %v184_v53, 0.0 }
 0x110   :  { %v280_v58 = vpack.c.bf16 %v252_v55, %v250_v54 }
 0x111   :  { %v281_v59 = vpack.c.bf16 %v253_v57, %v251_v56  ;;  %v187_v60 = vpop.f32.mrb[8].mxu0 }
 0x112   :  { %v188_v61 = vadd.f32 %v187_v60, %v1571_v30  ;;  %v189_v62 = vpop.f32.mrb[9].mxu0 }
 0x113   :  { %v190_v63 = vadd.f32 %v189_v62, %v1574_v31  ;;  %v191_v0 = vpop.f32.mrb[10].mxu0  ;;  %540 = vmatprep.mubr.bf16.mxu1 %v281_v59 }
 0x114   :  { %v192_v1 = vadd.f32 %v191_v0, %v1571_v30  ;;  %v193_v2 = vpop.f32.mrb[11].mxu0  ;;  %541 = vmatmul.mubr.bf16.gmra.mrb[4].mxu1 %v280_v58  ;;  %v254_v4 = vmax.f32 %v188_v61, 0.0 }
 0x115   :  { %v194_v3 = vadd.f32 %v193_v2, %v1574_v31  ;;  %v255_v6 = vmax.f32 %v190_v63, 0.0 }
 0x116   :  { %v256_v5 = vmax.f32 %v192_v1, 0.0 }
 0x117   :  { %v257_v7 = vmax.f32 %v194_v3, 0.0 }
 0x118   :  { %v282_v8 = vpack.c.bf16 %v256_v5, %v254_v4 }
 0x119   :  { %v283_v9 = vpack.c.bf16 %v257_v7, %v255_v6  ;;  %v197_v10 = vpop.f32.mrb[12].mxu0 }
 0x11a   :  { %v198_v11 = vadd.f32 %v197_v10, %v1571_v30  ;;  %v199_v12 = vpop.f32.mrb[13].mxu0 }
 0x11b   :  { %v200_v13 = vadd.f32 %v199_v12, %v1574_v31  ;;  %v201_v14 = vpop.f32.mrb[14].mxu0  ;;  %550 = vmatprep.mubr.bf16.mxu1 %v283_v9 }
 0x11c   :  { %v202_v15 = vadd.f32 %v201_v14, %v1571_v30  ;;  %v203_v16 = vpop.f32.mrb[15].mxu0  ;;  %551 = vmatmul.mubr.bf16.gmra.mrb[8].mxu1 %v282_v8  ;;  %v258_v18 = vmax.f32 %v198_v11, 0.0 }
 0x11d   :  { %v204_v17 = vadd.f32 %v203_v16, %v1574_v31  ;;  %v259_v20 = vmax.f32 %v200_v13, 0.0 }
 0x11e   :  { %v260_v19 = vmax.f32 %v202_v15, 0.0 }
 0x11f   :  { %v261_v21 = vmax.f32 %v204_v17, 0.0 }
 0x120   :  { %v284_v22 = vpack.c.bf16 %v260_v19, %v258_v18 }
 0x121   :  { %v285_v23 = vpack.c.bf16 %v261_v21, %v259_v20  ;;  %v207_v24 = vpop.f32.mrb[16].mxu0  ;;  %v1282_v20 = vld [vmem:[#allocation5 + $0xe4] ss:$8 sps:$4 sm:$0xff]   ;;  %v1280_v21 = vld [vmem:[#allocation5 + $0xe0] ss:$8 sps:$4 sm:$0xff]  }
 0x122   :  { %v208_v25 = vadd.f32 %v207_v24, %v1571_v30  ;;  %v209_v26 = vpop.f32.mrb[17].mxu0  ;;  %891 = vmatprep.subr.bf16.mxu0 %v1282_v20 }
 0x123   :  { %v210_v28 = vadd.f32 %v209_v26, %v1574_v31  ;;  %v211_v32 = vpop.f32.mrb[18].mxu0  ;;  %560 = vmatprep.mubr.bf16.mxu1 %v285_v23  ;;  %892 = vmatpush1.bf16.msra.mxu0 %v1280_v21  ;;  %v1283_v23 = vld [vmem:[#allocation5 + $0xf0] ss:$8 sps:$4 sm:$0xff]  }
 0x124   :  { %v212_v33 = vadd.f32 %v211_v32, %v1571_v30  ;;  %v213_v34 = vpop.f32.mrb[19].mxu0  ;;  %561 = vmatmul.mubr.bf16.gmra.mrb[12].mxu1 %v284_v22  ;;  %v262_v36 = vmax.f32 %v208_v25, 0.0  ;;  %v1285_v22 = vld [vmem:[#allocation5 + $0xf4] ss:$8 sps:$4 sm:$0xff]  }
 0x125   :  { %v214_v35 = vadd.f32 %v213_v34, %v1574_v31  ;;  %v263_v38 = vmax.f32 %v210_v28, 0.0  ;;  %893 = vmatprep.subr.bf16.mxu0 %v1285_v22 }
 0x126   :  { %v264_v37 = vmax.f32 %v212_v33, 0.0 }
 0x127   :  { %v265_v39 = vmax.f32 %v214_v35, 0.0  ;;  %894 = vmatpush1.bf16.msra.mxu0 %v1283_v23 }
 0x128   :  { %v286_v40 = vpack.c.bf16 %v264_v37, %v262_v36 }
 0x129   :  { %v287_v41 = vpack.c.bf16 %v265_v39, %v263_v38  ;;  %v217_v42 = vpop.f32.mrb[20].mxu0 }
 0x12a   :  { %v218_v43 = vadd.f32 %v217_v42, %v1571_v30  ;;  %v219_v44 = vpop.f32.mrb[21].mxu0 }
 0x12b   :  { %v220_v45 = vadd.f32 %v219_v44, %v1574_v31  ;;  %v221_v46 = vpop.f32.mrb[22].mxu0  ;;  %570 = vmatprep.mubr.bf16.mxu1 %v287_v41 }
 0x12c   :  { %v222_v47 = vadd.f32 %v221_v46, %v1571_v30  ;;  %v223_v48 = vpop.f32.mrb[23].mxu0  ;;  %571 = vmatmul.mubr.bf16.gmra.mrb[16].mxu1 %v286_v40  ;;  %v266_v50 = vmax.f32 %v218_v43, 0.0 }
 0x12d   :  { %v224_v49 = vadd.f32 %v223_v48, %v1574_v31  ;;  %v267_v52 = vmax.f32 %v220_v45, 0.0 }
 0x12e   :  { %v268_v51 = vmax.f32 %v222_v47, 0.0 }
 0x12f   :  { %v269_v53 = vmax.f32 %v224_v49, 0.0 }
 0x130   :  { %v288_v54 = vpack.c.bf16 %v268_v51, %v266_v50 }
 0x131   :  { %v289_v55 = vpack.c.bf16 %v269_v53, %v267_v52  ;;  %v227_v56 = vpop.f32.mrb[24].mxu0 }
 0x132   :  { %v228_v57 = vadd.f32 %v227_v56, %v1571_v30  ;;  %v229_v58 = vpop.f32.mrb[25].mxu0 }
 0x133   :  { %v230_v59 = vadd.f32 %v229_v58, %v1574_v31  ;;  %v231_v60 = vpop.f32.mrb[26].mxu0  ;;  %580 = vmatprep.mubr.bf16.mxu1 %v289_v55 }
 0x134   :  { %v232_v61 = vadd.f32 %v231_v60, %v1571_v30  ;;  %v233_v62 = vpop.f32.mrb[27].mxu0  ;;  %581 = vmatmul.mubr.bf16.gmra.mrb[20].mxu1 %v288_v54  ;;  %v270_v0 = vmax.f32 %v228_v57, 0.0 }
 0x135   :  { %v234_v63 = vadd.f32 %v233_v62, %v1574_v31  ;;  %v271_v2 = vmax.f32 %v230_v59, 0.0 }
 0x136   :  { %v272_v1 = vmax.f32 %v232_v61, 0.0 }
 0x137   :  { %v273_v3 = vmax.f32 %v234_v63, 0.0 }
 0x138   :  { %v290_v4 = vpack.c.bf16 %v272_v1, %v270_v0 }
 0x139   :  { %v291_v5 = vpack.c.bf16 %v273_v3, %v271_v2  ;;  %v237_v6 = vpop.f32.mrb[28].mxu0 }
 0x13a   :  { %v238_v7 = vadd.f32 %v237_v6, %v1571_v30  ;;  %v239_v8 = vpop.f32.mrb[29].mxu0 }
 0x13b   :  { %v240_v9 = vadd.f32 %v239_v8, %v1574_v31  ;;  %v241_v10 = vpop.f32.mrb[30].mxu0  ;;  %590 = vmatprep.mubr.bf16.mxu1 %v291_v5 }
 0x13c   :  { %v242_v11 = vadd.f32 %v241_v10, %v1571_v30  ;;  %v243_v12 = vpop.f32.mrb[31].mxu0  ;;  %591 = vmatmul.mubr.bf16.gmra.mrb[24].mxu1 %v290_v4  ;;  %v274_v14 = vmax.f32 %v238_v7, 0.0  ;;  %v326_v30 = vld [vmem:[%s1724_s4] sm:$0x3] }
 0x13d   :  { %v244_v13 = vadd.f32 %v243_v12, %v1574_v31  ;;  %v275_v16 = vmax.f32 %v240_v9, 0.0  ;;  %v1612_v31 = vrot.slane %v326_v30, %v1563_v27  ;;  %v1615_v24 = vrot.slane %v326_v30, %v1568_v29 }
 0x13e   :  { %v276_v15 = vmax.f32 %v242_v11, 0.0 }
 0x13f   :  { %v277_v17 = vmax.f32 %v244_v13, 0.0 }
 0x140   :  { %v292_v18 = vpack.c.bf16 %v276_v15, %v274_v14 }
 0x141   :  { %v293_v19 = vpack.c.bf16 %v277_v17, %v275_v16 }
 0x143   :  { %600 = vmatprep.mubr.bf16.mxu1 %v293_v19 }
 0x144   :  { %601 = vmatmul.mubr.bf16.gmra.mrb[28].mxu1 %v292_v18 }
 0x1df   :  { %v532_v25 = vpop.f32.mrb[0].mxu1 }
 0x1e0   :  { %v533_v26 = vadd.f32 %v532_v25, %v1612_v31  ;;  %v534_v28 = vpop.f32.mrb[1].mxu1 }
 0x1e1   :  { %v535_v32 = vadd.f32 %v534_v28, %v1615_v24  ;;  %v536_v33 = vpop.f32.mrb[2].mxu1 }
 0x1e2   :  { %v537_v34 = vadd.f32 %v536_v33, %v1612_v31  ;;  %v538_v35 = vpop.f32.mrb[3].mxu1  ;;  %v611_v37 = vmax.f32 %v533_v26, 0.0 }
 0x1e3   :  { %v539_v36 = vadd.f32 %v538_v35, %v1615_v24  ;;  %v612_v39 = vmax.f32 %v535_v32, 0.0 }
 0x1e4   :  { %v613_v38 = vmax.f32 %v537_v34, 0.0 }
 0x1e5   :  { %v614_v40 = vmax.f32 %v539_v36, 0.0 }
 0x1e6   :  { %v643_v41 = vpack.c.bf16 %v613_v38, %v611_v37 }
 0x1e7   :  { %v644_v42 = vpack.c.bf16 %v614_v40, %v612_v39  ;;  %v542_v43 = vpop.f32.mrb[4].mxu1 }
 0x1e8   :  { %v543_v44 = vadd.f32 %v542_v43, %v1612_v31  ;;  %v544_v45 = vpop.f32.mrb[5].mxu1 }
 0x1e9   :  { %v545_v46 = vadd.f32 %v544_v45, %v1615_v24  ;;  %v546_v47 = vpop.f32.mrb[6].mxu1  ;;  %895 = vmatprep.mubr.bf16.mxu0 %v644_v42 }
 0x1ea   :  { %v547_v48 = vadd.f32 %v546_v47, %v1612_v31  ;;  %v548_v49 = vpop.f32.mrb[7].mxu1  ;;  %896 = vmatmul.mubr.bf16.vlgmr.msra.gmra.mrb[32].mxu0 %v643_v41  ;;  %v615_v51 = vmax.f32 %v543_v44, 0.0 }
 0x1eb   :  { %v549_v50 = vadd.f32 %v548_v49, %v1615_v24  ;;  %v616_v53 = vmax.f32 %v545_v46, 0.0 }
 0x1ec   :  { %v617_v52 = vmax.f32 %v547_v48, 0.0 }
 0x1ed   :  { %v618_v54 = vmax.f32 %v549_v50, 0.0 }
 0x1ee   :  { %v645_v55 = vpack.c.bf16 %v617_v52, %v615_v51 }
 0x1ef   :  { %v646_v56 = vpack.c.bf16 %v618_v54, %v616_v53  ;;  %v552_v57 = vpop.f32.mrb[8].mxu1 }
 0x1f0   :  { %v553_v58 = vadd.f32 %v552_v57, %v1612_v31  ;;  %v554_v59 = vpop.f32.mrb[9].mxu1 }
 0x1f1   :  { %v555_v60 = vadd.f32 %v554_v59, %v1615_v24  ;;  %v556_v61 = vpop.f32.mrb[10].mxu1  ;;  %905 = vmatprep.mubr.bf16.mxu0 %v646_v56 }
 0x1f2   :  { %v557_v62 = vadd.f32 %v556_v61, %v1612_v31  ;;  %v558_v63 = vpop.f32.mrb[11].mxu1  ;;  %906 = vmatmul.mubr.bf16.gmra.mrb[36].mxu0 %v645_v55  ;;  %v619_v1 = vmax.f32 %v553_v58, 0.0 }
 0x1f3   :  { %v559_v0 = vadd.f32 %v558_v63, %v1615_v24  ;;  %v620_v3 = vmax.f32 %v555_v60, 0.0 }
 0x1f4   :  { %v621_v2 = vmax.f32 %v557_v62, 0.0 }
 0x1f5   :  { %v622_v4 = vmax.f32 %v559_v0, 0.0 }
 0x1f6   :  { %v647_v5 = vpack.c.bf16 %v621_v2, %v619_v1 }
 0x1f7   :  { %v648_v6 = vpack.c.bf16 %v622_v4, %v620_v3  ;;  %v562_v7 = vpop.f32.mrb[12].mxu1 }
 0x1f8   :  { %v563_v8 = vadd.f32 %v562_v7, %v1612_v31  ;;  %v564_v9 = vpop.f32.mrb[13].mxu1 }
 0x1f9   :  { %v565_v10 = vadd.f32 %v564_v9, %v1615_v24  ;;  %v566_v11 = vpop.f32.mrb[14].mxu1  ;;  %915 = vmatprep.mubr.bf16.mxu0 %v648_v6 }
 0x1fa   :  { %v567_v12 = vadd.f32 %v566_v11, %v1612_v31  ;;  %v568_v13 = vpop.f32.mrb[15].mxu1  ;;  %916 = vmatmul.mubr.bf16.gmra.mrb[40].mxu0 %v647_v5  ;;  %v623_v15 = vmax.f32 %v563_v8, 0.0 }
 0x1fb   :  { %v569_v14 = vadd.f32 %v568_v13, %v1615_v24  ;;  %v624_v17 = vmax.f32 %v565_v10, 0.0 }
 0x1fc   :  { %v625_v16 = vmax.f32 %v567_v12, 0.0 }
 0x1fd   :  { %v626_v18 = vmax.f32 %v569_v14, 0.0 }
 0x1fe   :  { %v649_v19 = vpack.c.bf16 %v625_v16, %v623_v15 }
 0x1ff   :  { %v650_v20 = vpack.c.bf16 %v626_v18, %v624_v17  ;;  %v572_v21 = vpop.f32.mrb[16].mxu1  ;;  %v691_v17 = vld [vmem:[%s1726_s6] sm:$0x3]  ;;  %s1419_s6 = smov [#allocation7]  }
 0x200   :  { %v573_v22 = vadd.f32 %v572_v21, %v1612_v31  ;;  %v574_v23 = vpop.f32.mrb[17].mxu1  ;;  %v1653_v18 = vrot.slane %v691_v17, %v1563_v27  ;;  %s1077_s22 = sshll.u32 %s1419_s6, 4  ;;  %s1078_s22 = int_to_ptr.vmem [resolvable:$true] %s1077_s22 }
 0x201   :  { %v575_v30 = vadd.f32 %v574_v23, %v1615_v24  ;;  %v576_v25 = vpop.f32.mrb[18].mxu1  ;;  %925 = vmatprep.mubr.bf16.mxu0 %v650_v20  ;;  %s1362_s23 = scalar_lea.vmem %s1078_s22, 2048  ;;  %p1367_p3 = scmp.lt.s32.totalorder %s1078_s22, %s1078_s22 }
 0x202   :  { %v577_v26 = vadd.f32 %v576_v25, %v1612_v31  ;;  %v578_v28 = vpop.f32.mrb[19].mxu1  ;;  %926 = vmatmul.mubr.bf16.gmra.mrb[44].mxu0 %v649_v19  ;;  %v627_v33 = vmax.f32 %v573_v22, 0.0  ;;  %p1363_p2 = scmp.ne.s32.totalorder %s1078_s22, %s1362_s23  ;;  %p1368_p4 = scmp.lt.s32.totalorder %s1362_s23, %s1362_s23 }
 0x203   :  { %v579_v32 = vadd.f32 %v578_v28, %v1615_v24  ;;  %v628_v35 = vmax.f32 %v575_v30, 0.0 }
 0x204   :  { %v629_v34 = vmax.f32 %v577_v26, 0.0  ;;  %p1369_p5 = por %p1368_p4, %p1367_p3 }
 0x205   :  { %v630_v36 = vmax.f32 %v579_v32, 0.0 }
 0x206   :  { %v651_v37 = vpack.c.bf16 %v629_v34, %v627_v33  ;;  %p1370_p6 = pnand %p1369_p5, %p1363_p2 }
 0x207   :  { %v652_v38 = vpack.c.bf16 %v630_v36, %v628_v35  ;;  %v582_v39 = vpop.f32.mrb[20].mxu1 }
 0x208   :  { %v583_v40 = vadd.f32 %v582_v39, %v1612_v31  ;;  %v584_v41 = vpop.f32.mrb[21].mxu1 }
 0x209   :  { %v585_v42 = vadd.f32 %v584_v41, %v1615_v24  ;;  %v586_v43 = vpop.f32.mrb[22].mxu1  ;;  %935 = vmatprep.mubr.bf16.mxu0 %v652_v38 }
 0x20a   :  { %v587_v44 = vadd.f32 %v586_v43, %v1612_v31  ;;  %v588_v45 = vpop.f32.mrb[23].mxu1  ;;  %936 = vmatmul.mubr.bf16.gmra.mrb[48].mxu0 %v651_v37  ;;  %v631_v47 = vmax.f32 %v583_v40, 0.0 }
 0x20b   :  { %v589_v46 = vadd.f32 %v588_v45, %v1615_v24  ;;  %v632_v49 = vmax.f32 %v585_v42, 0.0 }
 0x20c   :  { %v633_v48 = vmax.f32 %v587_v44, 0.0 }
 0x20d   :  { %v634_v50 = vmax.f32 %v589_v46, 0.0 }
 0x20e   :  { %v653_v51 = vpack.c.bf16 %v633_v48, %v631_v47 }
 0x20f   :  { %v654_v52 = vpack.c.bf16 %v634_v50, %v632_v49  ;;  %v592_v53 = vpop.f32.mrb[24].mxu1 }
 0x210   :  { %v593_v54 = vadd.f32 %v592_v53, %v1612_v31  ;;  %v594_v55 = vpop.f32.mrb[25].mxu1 }
 0x211   :  { %v595_v56 = vadd.f32 %v594_v55, %v1615_v24  ;;  %v596_v57 = vpop.f32.mrb[26].mxu1  ;;  %945 = vmatprep.mubr.bf16.mxu0 %v654_v52 }
 0x212   :  { %v597_v58 = vadd.f32 %v596_v57, %v1612_v31  ;;  %v598_v59 = vpop.f32.mrb[27].mxu1  ;;  %946 = vmatmul.mubr.bf16.gmra.mrb[52].mxu0 %v653_v51  ;;  %v635_v61 = vmax.f32 %v593_v54, 0.0 }
 0x213   :  { %v599_v60 = vadd.f32 %v598_v59, %v1615_v24  ;;  %v636_v63 = vmax.f32 %v595_v56, 0.0 }
 0x214   :  { %v637_v62 = vmax.f32 %v597_v58, 0.0 }
 0x215   :  { %v638_v0 = vmax.f32 %v599_v60, 0.0 }
 0x216   :  { %v655_v1 = vpack.c.bf16 %v637_v62, %v635_v61 }
 0x217   :  { %v656_v2 = vpack.c.bf16 %v638_v0, %v636_v63  ;;  %v602_v3 = vpop.f32.mrb[28].mxu1 }
 0x218   :  { %v603_v4 = vadd.f32 %v602_v3, %v1612_v31  ;;  %v604_v5 = vpop.f32.mrb[29].mxu1 }
 0x219   :  { %v605_v6 = vadd.f32 %v604_v5, %v1615_v24  ;;  %v606_v7 = vpop.f32.mrb[30].mxu1  ;;  %955 = vmatprep.mubr.bf16.mxu0 %v656_v2 }
 0x21a   :  { %v607_v8 = vadd.f32 %v606_v7, %v1612_v31  ;;  %v608_v9 = vpop.f32.mrb[31].mxu1  ;;  %956 = vmatmul.mubr.bf16.gmra.mrb[56].mxu0 %v655_v1  ;;  %v639_v11 = vmax.f32 %v603_v4, 0.0  ;;  %v1656_v31 = vrot.slane %v691_v17, %v1568_v29 }
 0x21b   :  { %v609_v10 = vadd.f32 %v608_v9, %v1615_v24  ;;  %v640_v13 = vmax.f32 %v605_v6, 0.0 }
 0x21c   :  { %v641_v12 = vmax.f32 %v607_v8, 0.0 }
 0x21d   :  { %v642_v14 = vmax.f32 %v609_v10, 0.0 }
 0x21e   :  { %v657_v15 = vpack.c.bf16 %v641_v12, %v639_v11 }
 0x21f   :  { %v658_v16 = vpack.c.bf16 %v642_v14, %v640_v13 }
 0x221   :  { %965 = vmatprep.mubr.bf16.mxu0 %v658_v16 }
 0x222   :  { %966 = vmatmul.mubr.bf16.gmra.mrb[60].mxu0 %v657_v15 }
 0x2bd   :  { %v897_v19 = vpop.f32.mrb[32].mxu0 }
 0x2be   :  { %v898_v24 = vadd.f32 %v897_v19, %v1653_v18  ;;  %v899_v20 = vpop.f32.mrb[33].mxu0 }
 0x2bf   :  { %v900_v21 = vadd.f32 %v899_v20, %v1656_v31  ;;  %v901_v22 = vpop.f32.mrb[34].mxu0 }
 0x2c0   :  { %976 = vst [vmem:[#allocation7] sm:$0xff] %v898_v24  ;;  %v902_v23 = vadd.f32 %v901_v22, %v1653_v18  ;;  %v903_v30 = vpop.f32.mrb[35].mxu0 }
 0x2c1   :  { %v992_v25 = vmax.f32 %v900_v21, -20.0  ;;  %v904_v26 = vadd.f32 %v903_v30, %v1656_v31 }
 0x2c2   :  { %977 = vst [vmem:[#allocation7 + $0x8] sm:$0xff] %v902_v23 }
 0x2c3   :  { %v1008_v27 = vmin.f32 %v992_v25, 2.0  ;;  %v993_v28 = vmax.f32 %v904_v26, -20.0 }
 0x2c5   :  { %v1024_v32 = vmul.f32 1.442695, %v1008_v27  ;;  %v1009_v29 = vmin.f32 %v993_v28, 2.0  ;;  %v907_v33 = vpop.f32.mrb[36].mxu0 }
 0x2c6   :  { %v908_v34 = vadd.f32 %v907_v33, %v1653_v18  ;;  %v909_v35 = vpop.f32.mrb[37].mxu0 }
 0x2c7   :  { %1286 = vpow2.f32 %v1024_v32  ;;  %v1026_v36 = vmul.f32 1.442695, %v1009_v29  ;;  %v910_v37 = vadd.f32 %v909_v35, %v1656_v31  ;;  %v911_v38 = vpop.f32.mrb[38].mxu0 }
 0x2c8   :  { %978 = vst [vmem:[#allocation7 + $0x10] sm:$0xff] %v908_v34  ;;  %v912_v39 = vadd.f32 %v911_v38, %v1653_v18  ;;  %v913_v40 = vpop.f32.mrb[39].mxu0 }
 0x2c9   :  { %1288 = vpow2.f32 %v1026_v36  ;;  %v994_v41 = vmax.f32 %v910_v37, -20.0  ;;  %v914_v42 = vadd.f32 %v913_v40, %v1656_v31 }
 0x2ca   :  { %979 = vst [vmem:[#allocation7 + $0x18] sm:$0xff] %v912_v39 }
 0x2cb   :  { %v1010_v43 = vmin.f32 %v994_v41, 2.0  ;;  %v995_v44 = vmax.f32 %v914_v42, -20.0 }
 0x2cd   :  { %v1028_v45 = vmul.f32 1.442695, %v1010_v43  ;;  %v1011_v46 = vmin.f32 %v995_v44, 2.0  ;;  %v917_v47 = vpop.f32.mrb[40].mxu0 }
 0x2ce   :  { %v918_v48 = vadd.f32 %v917_v47, %v1653_v18  ;;  %v919_v49 = vpop.f32.mrb[41].mxu0 }
 0x2cf   :  { %1290 = vpow2.f32 %v1028_v45  ;;  %v1030_v50 = vmul.f32 1.442695, %v1011_v46  ;;  %v920_v51 = vadd.f32 %v919_v49, %v1656_v31  ;;  %v921_v52 = vpop.f32.mrb[42].mxu0 }
 0x2d0   :  { %980 = vst [vmem:[#allocation7 + $0x20] sm:$0xff] %v918_v48  ;;  %v922_v53 = vadd.f32 %v921_v52, %v1653_v18  ;;  %v923_v54 = vpop.f32.mrb[43].mxu0 }
 0x2d1   :  { %v1287_v55 = vpop.eup %1286  ;;  %1292 = vpow2.f32 %v1030_v50  ;;  %v996_v56 = vmax.f32 %v920_v51, -20.0  ;;  %v924_v57 = vadd.f32 %v923_v54, %v1656_v31 }
 0x2d2   :  { %1056 = vst [vmem:[#allocation8] sm:$0xff] %v1287_v55  ;;  %981 = vst [vmem:[#allocation7 + $0x28] sm:$0xff] %v922_v53 }
 0x2d3   :  { %v1289_v58 = vpop.eup %1288  ;;  %v1012_v59 = vmin.f32 %v996_v56, 2.0  ;;  %v997_v60 = vmax.f32 %v924_v57, -20.0 }
 0x2d4   :  { %1057 = vst [vmem:[#allocation8 + $0x8] sm:$0xff] %v1289_v58 }
 0x2d5   :  { %v1032_v61 = vmul.f32 1.442695, %v1012_v59  ;;  %v1013_v62 = vmin.f32 %v997_v60, 2.0  ;;  %v927_v63 = vpop.f32.mrb[44].mxu0 }
 0x2d6   :  { %v928_v0 = vadd.f32 %v927_v63, %v1653_v18  ;;  %v929_v1 = vpop.f32.mrb[45].mxu0 }
 0x2d7   :  { %1294 = vpow2.f32 %v1032_v61  ;;  %v1034_v2 = vmul.f32 1.442695, %v1013_v62  ;;  %v930_v3 = vadd.f32 %v929_v1, %v1656_v31  ;;  %v931_v4 = vpop.f32.mrb[46].mxu0 }
 0x2d8   :  { %982 = vst [vmem:[#allocation7 + $0x30] sm:$0xff] %v928_v0  ;;  %v932_v5 = vadd.f32 %v931_v4, %v1653_v18  ;;  %v933_v6 = vpop.f32.mrb[47].mxu0 }
 0x2d9   :  { %v1291_v7 = vpop.eup %1290  ;;  %1296 = vpow2.f32 %v1034_v2  ;;  %v998_v8 = vmax.f32 %v930_v3, -20.0  ;;  %v934_v9 = vadd.f32 %v933_v6, %v1656_v31 }
 0x2da   :  { %1058 = vst [vmem:[#allocation8 + $0x10] sm:$0xff] %v1291_v7  ;;  %983 = vst [vmem:[#allocation7 + $0x38] sm:$0xff] %v932_v5 }
 0x2db   :  { %v1293_v10 = vpop.eup %1292  ;;  %v1014_v11 = vmin.f32 %v998_v8, 2.0  ;;  %v999_v12 = vmax.f32 %v934_v9, -20.0 }
 0x2dc   :  { %1059 = vst [vmem:[#allocation8 + $0x18] sm:$0xff] %v1293_v10 }
 0x2dd   :  { %v1036_v13 = vmul.f32 1.442695, %v1014_v11  ;;  %v1015_v14 = vmin.f32 %v999_v12, 2.0  ;;  %v937_v15 = vpop.f32.mrb[48].mxu0 }
 0x2de   :  { %v938_v16 = vadd.f32 %v937_v15, %v1653_v18  ;;  %v939_v17 = vpop.f32.mrb[49].mxu0 }
 0x2df   :  { %1298 = vpow2.f32 %v1036_v13  ;;  %v1038_v19 = vmul.f32 1.442695, %v1015_v14  ;;  %v940_v24 = vadd.f32 %v939_v17, %v1656_v31  ;;  %v941_v20 = vpop.f32.mrb[50].mxu0 }
 0x2e0   :  { %984 = vst [vmem:[#allocation7 + $0x40] sm:$0xff] %v938_v16  ;;  %v942_v21 = vadd.f32 %v941_v20, %v1653_v18  ;;  %v943_v22 = vpop.f32.mrb[51].mxu0 }
 0x2e1   :  { %v1295_v23 = vpop.eup %1294  ;;  %1300 = vpow2.f32 %v1038_v19  ;;  %v1000_v30 = vmax.f32 %v940_v24, -20.0  ;;  %v944_v25 = vadd.f32 %v943_v22, %v1656_v31 }
 0x2e2   :  { %1060 = vst [vmem:[#allocation8 + $0x20] sm:$0xff] %v1295_v23  ;;  %985 = vst [vmem:[#allocation7 + $0x48] sm:$0xff] %v942_v21 }
 0x2e3   :  { %v1297_v26 = vpop.eup %1296  ;;  %v1016_v27 = vmin.f32 %v1000_v30, 2.0  ;;  %v1001_v28 = vmax.f32 %v944_v25, -20.0 }
 0x2e4   :  { %1061 = vst [vmem:[#allocation8 + $0x28] sm:$0xff] %v1297_v26 }
 0x2e5   :  { %v1040_v32 = vmul.f32 1.442695, %v1016_v27  ;;  %v1017_v29 = vmin.f32 %v1001_v28, 2.0  ;;  %v947_v33 = vpop.f32.mrb[52].mxu0 }
 0x2e6   :  { %v948_v34 = vadd.f32 %v947_v33, %v1653_v18  ;;  %v949_v35 = vpop.f32.mrb[53].mxu0 }
 0x2e7   :  { %1302 = vpow2.f32 %v1040_v32  ;;  %v1042_v36 = vmul.f32 1.442695, %v1017_v29  ;;  %v950_v37 = vadd.f32 %v949_v35, %v1656_v31  ;;  %v951_v38 = vpop.f32.mrb[54].mxu0 }
 0x2e8   :  { %986 = vst [vmem:[#allocation7 + $0x50] sm:$0xff] %v948_v34  ;;  %v952_v39 = vadd.f32 %v951_v38, %v1653_v18  ;;  %v953_v40 = vpop.f32.mrb[55].mxu0 }
 0x2e9   :  { %v1299_v41 = vpop.eup %1298  ;;  %1304 = vpow2.f32 %v1042_v36  ;;  %v1002_v42 = vmax.f32 %v950_v37, -20.0  ;;  %v954_v43 = vadd.f32 %v953_v40, %v1656_v31 }
 0x2ea   :  { %1062 = vst [vmem:[#allocation8 + $0x30] sm:$0xff] %v1299_v41  ;;  %987 = vst [vmem:[#allocation7 + $0x58] sm:$0xff] %v952_v39 }
 0x2eb   :  { %v1301_v44 = vpop.eup %1300  ;;  %v1018_v45 = vmin.f32 %v1002_v42, 2.0  ;;  %v1003_v46 = vmax.f32 %v954_v43, -20.0 }
 0x2ec   :  { %1063 = vst [vmem:[#allocation8 + $0x38] sm:$0xff] %v1301_v44 }
 0x2ed   :  { %v1044_v47 = vmul.f32 1.442695, %v1018_v45  ;;  %v1019_v48 = vmin.f32 %v1003_v46, 2.0  ;;  %v957_v49 = vpop.f32.mrb[56].mxu0 }
 0x2ee   :  { %v958_v50 = vadd.f32 %v957_v49, %v1653_v18  ;;  %v959_v51 = vpop.f32.mrb[57].mxu0 }
 0x2ef   :  { %1306 = vpow2.f32 %v1044_v47  ;;  %v1046_v52 = vmul.f32 1.442695, %v1019_v48  ;;  %v960_v53 = vadd.f32 %v959_v51, %v1656_v31  ;;  %v961_v54 = vpop.f32.mrb[58].mxu0 }
 0x2f0   :  { %988 = vst [vmem:[#allocation7 + $0x60] sm:$0xff] %v958_v50  ;;  %v962_v55 = vadd.f32 %v961_v54, %v1653_v18  ;;  %v963_v56 = vpop.f32.mrb[59].mxu0 }
 0x2f1   :  { %v1303_v57 = vpop.eup %1302  ;;  %1308 = vpow2.f32 %v1046_v52  ;;  %v1004_v58 = vmax.f32 %v960_v53, -20.0  ;;  %v964_v59 = vadd.f32 %v963_v56, %v1656_v31 }
 0x2f2   :  { %1064 = vst [vmem:[#allocation8 + $0x40] sm:$0xff] %v1303_v57  ;;  %989 = vst [vmem:[#allocation7 + $0x68] sm:$0xff] %v962_v55 }
 0x2f3   :  { %v1305_v60 = vpop.eup %1304  ;;  %v1020_v61 = vmin.f32 %v1004_v58, 2.0  ;;  %v1005_v62 = vmax.f32 %v964_v59, -20.0 }
 0x2f4   :  { %1065 = vst [vmem:[#allocation8 + $0x48] sm:$0xff] %v1305_v60 }
 0x2f5   :  { %v1048_v63 = vmul.f32 1.442695, %v1020_v61  ;;  %v1021_v0 = vmin.f32 %v1005_v62, 2.0  ;;  %v967_v1 = vpop.f32.mrb[60].mxu0 }
 0x2f6   :  { %v968_v2 = vadd.f32 %v967_v1, %v1653_v18  ;;  %v969_v3 = vpop.f32.mrb[61].mxu0 }
 0x2f7   :  { %1310 = vpow2.f32 %v1048_v63  ;;  %v1050_v4 = vmul.f32 1.442695, %v1021_v0  ;;  %v970_v5 = vadd.f32 %v969_v3, %v1656_v31  ;;  %v971_v6 = vpop.f32.mrb[62].mxu0 }
 0x2f8   :  { %990 = vst [vmem:[#allocation7 + $0x70] sm:$0xff] %v968_v2  ;;  %v972_v7 = vadd.f32 %v971_v6, %v1653_v18  ;;  %v973_v8 = vpop.f32.mrb[63].mxu0 }
 0x2f9   :  { %v1307_v9 = vpop.eup %1306  ;;  %1312 = vpow2.f32 %v1050_v4  ;;  %v1006_v10 = vmax.f32 %v970_v5, -20.0  ;;  %v974_v11 = vadd.f32 %v973_v8, %v1656_v31 }
 0x2fa   :  { %1066 = vst [vmem:[#allocation8 + $0x50] sm:$0xff] %v1307_v9  ;;  %991 = vst [vmem:[#allocation7 + $0x78] sm:$0xff] %v972_v7 }
 0x2fb   :  { %v1309_v12 = vpop.eup %1308  ;;  %v1022_v13 = vmin.f32 %v1006_v10, 2.0  ;;  %v1007_v14 = vmax.f32 %v974_v11, -20.0 }
 0x2fc   :  { %1373 = shalt.err (!%p1370_p6)
}
 0x2fd   :  { %s1374_s26 = scalar_lea.hbm %s1727_s7, 2048 }
 0x2fe   :  { %p1375_p7 = scmp.ne.s32.totalorder %s1727_s7, %s1374_s26  ;;  %p1378_p8 = scmp.lt.u32.totalorder %s1374_s26, %s1727_s7 }
 0x300   :  { %p1380_p9 = pnand %p1378_p8, %p1375_p7 }
 0x302   :  { %1383 = shalt.err (!%p1380_p9)
}
 0x303   :  { %1083 = dma.vmem_to_hbm [thread:$0]  %s1078_s22, 2048, %s1727_s7, [#allocation4], %s1415_s15, %s1415_s15, %s1416_s16   ;;  %1067 = vst [vmem:[#allocation8 + $0x58] sm:$0xff] %v1309_v12  ;;  %v1052_v18 = vmul.f32 1.442695, %v1022_v13  ;;  %v1023_v31 = vmin.f32 %v1007_v14, 2.0  ;;  %v1311_v16 = vpop.eup %1310 }
 0x304   :  { %1068 = vst [vmem:[#allocation8 + $0x60] sm:$0xff] %v1311_v16  ;;  %v1313_v17 = vpop.eup %1312  ;;  %s1420_s10 = smov [#allocation8]  }
 0x305   :  { %1314 = vpow2.f32 %v1052_v18  ;;  %v1054_v15 = vmul.f32 1.442695, %v1023_v31  ;;  %1069 = vst [vmem:[#allocation8 + $0x68] sm:$0xff] %v1313_v17  ;;  %s1089_s11 = sshll.u32 %s1420_s10, 4  ;;  %s1090_s11 = int_to_ptr.vmem [resolvable:$true] %s1089_s11 }
 0x306   :  { %s1384_s12 = scalar_lea.vmem %s1090_s11, 2048  ;;  %p1389_p11 = scmp.lt.s32.totalorder %s1090_s11, %s1090_s11 }
 0x307   :  { %1316 = vpow2.f32 %v1054_v15  ;;  %p1385_p10 = scmp.ne.s32.totalorder %s1090_s11, %s1384_s12  ;;  %p1390_p12 = scmp.lt.s32.totalorder %s1384_s12, %s1384_s12 }
 0x309   :  { %p1391_p13 = por %p1390_p12, %p1389_p11 }
 0x30b   :  { %p1392_p0 = pnand %p1391_p13, %p1385_p10 }
 0x30f   :  { %v1315_v19 = vpop.eup %1314 }
 0x310   :  { %1070 = vst [vmem:[#allocation8 + $0x70] sm:$0xff] %v1315_v19 }
 0x311   :  { %v1317_v24 = vpop.eup %1316 }
 0x312   :  { %1071 = vst [vmem:[#allocation8 + $0x78] sm:$0xff] %v1317_v24 }
 0x313   :  { %1395 = shalt.err (!%p1392_p0)
}
 0x314   :  { %s1396_s5 = scalar_lea.hbm %s1728_s8, 2048 }
 0x315   :  { %p1397_p1 = scmp.ne.s32.totalorder %s1728_s8, %s1396_s5  ;;  %p1400_p2 = scmp.lt.u32.totalorder %s1396_s5, %s1728_s8 }
 0x317   :  { %p1402_p3 = pnand %p1400_p2, %p1397_p1 }
 0x319   :  { %1405 = shalt.err (!%p1402_p3)
}
 0x31a   :  { %1095 = dma.vmem_to_hbm [thread:$0]  %s1090_s11, 2048, %s1728_s8, [#allocation9], %s1415_s15, %s1415_s15, %s1416_s16  }
 0x31b   :  { %1410 = dma.done.wait [#allocation4], 2048  }
 0x31c   :  { %1411 = vsyncadd [#allocation4], 4294965248 }
 0x31d   :  { %1412 = dma.done.wait [#allocation9], 2048  }
 0x31e   :  { %1413 = vsyncadd [#allocation9], 4294965248 }
 0x31f   :  { %1102 = vsyncpa [#allocation3], 1 }
 0x320   :  { %1103 = vsyncpa [#allocation6], 1 }
 0x321   :  { %1104 = vsyncpa [#allocation4], 1 }
 0x322   :  { %1105 = vsyncpa [#allocation9], 1 }

</bundles_post_ra>
